<compile_context>
chip_gen: v7x
topology: tpu7x:2x2x1
jax: 0.10.0
libtpu: 0.0.40
codegen_flags: <defaults>
</compile_context>

<pallas_src>
import jax
import jax.numpy as jnp
from jax.experimental import pallas as pl
from jax.experimental.pallas import tpu as pltpu


def _round_up(x, m):
    return ((x + m - 1) // m) * m


def _make_kernel(tn, num_n):
    def kernel(x_ref, w_ref, b_ref, o_ref):
        # x_ref: (TM, H_pad)  w_ref: (H_pad, TN)  b_ref: (1, TN)  o_ref: (TM, TN)
        x = x_ref[...]
        y = jnp.dot(x, w_ref[...], preferred_element_type=jnp.float32)   # MXU
        y = y + b_ref[...].astype(jnp.float32)
        if num_n == 1:
            x_res = x                                  # residual = full row tile
        else:
            # residual columns matching this output strip (128-aligned offset)
            off = pl.multiple_of(pl.program_id(0) * tn, 128)
            x_res = x_ref[:, pl.ds(off, tn)]
        o_ref[...] = (y + x_res.astype(jnp.float32)).astype(o_ref.dtype)
    return kernel


def _pick_tn(h_pad, tm, itemsize, budget_bytes=40 * 1024 * 1024):
    """Largest TN (multiple of 128 that divides h_pad) whose buffers fit budget."""
    tn = h_pad
    while tn >= 128:
        if h_pad % tn == 0:
            need = itemsize * (2 * tm * h_pad      # x row tile, double buffered
                               + 2 * h_pad * tn    # W strip, double buffered
                               + 2 * tm * tn       # out tile, double buffered
                               + 2 * tn)           # bias strip
            if need <= budget_bytes:
                return tn
        tn -= 128
    return 128


@jax.jit
def residual_add_linear(x, w, b):
    """out = x @ w + b + x,   x: (N, H), w: (H, H), b: (1, H)  ->  (N, H)."""
    N, H = x.shape
    itemsize = jnp.dtype(x.dtype).itemsize

    # Tile sizes: sublane-multiple rows, lane dim padded to a 128 multiple.
    sub = 8 if itemsize == 4 else 16
    H_pad = _round_up(H, 128)
    TM = min(256, _round_up(N, sub))
    N_pad = _round_up(N, TM)
    TN = _pick_tn(H_pad, TM, itemsize)
    num_m = N_pad // TM
    num_n = H_pad // TN

    # Zero-pad: padded W rows/cols, b lanes and x cols are zero, so the valid
    # region out[:N, :H] equals x @ w + b + x exactly.
    x_p = jnp.pad(x, ((0, N_pad - N), (0, H_pad - H)))
    w_p = jnp.pad(w, ((0, H_pad - H), (0, H_pad - H)))
    b_p = jnp.pad(b, ((0, 0), (0, H_pad - H)))

    vmem_need = itemsize * (2 * TM * H_pad + 2 * H_pad * TN + 2 * TM * TN + 2 * TN)
    vmem_limit = max(int(vmem_need * 1.5), 16 * 1024 * 1024)

    cost = pl.CostEstimate(
        flops=2 * N_pad * H_pad * H_pad + 2 * N_pad * H_pad,
        transcendentals=0,
        bytes_accessed=itemsize * (num_n * N_pad * H_pad       # x reads
                                   + H_pad * H_pad + H_pad     # W, b reads
                                   + N_pad * H_pad),           # out writes
    )

    out_p = pl.pallas_call(
        _make_kernel(TN, num_n),
        out_shape=jax.ShapeDtypeStruct((N_pad, H_pad), x.dtype),
        # W-strip axis (j) outermost so each strip of W is DMA'd once and stays
        # VMEM-resident; row tiles (i) innermost stream x/out through VMEM.
        grid=(num_n, num_m),
        in_specs=[
            pl.BlockSpec((TM, H_pad), lambda j, i: (i, 0)),   # x rows, full width
            pl.BlockSpec((H_pad, TN), lambda j, i: (0, j)),   # resident W strip
            pl.BlockSpec((1, TN), lambda j, i: (0, j)),       # bias strip
        ],
        out_specs=pl.BlockSpec((TM, TN), lambda j, i: (i, j)),
        compiler_params=pltpu.CompilerParams(
            dimension_semantics=("parallel", "parallel"),
            vmem_limit_bytes=vmem_limit,
        ),
        # Alias x with out only when W is untiled: then each x row tile is fully
        # read before the matching out tile is written back (no RAW hazard).
        input_output_aliases={0: 0} if num_n == 1 else {},
        cost_estimate=cost,
    )(x_p, w_p, b_p)

    return out_p[:N, :H]


if __name__ == "__main__":
    batch, seq, hidden = 2, 8, 32

    key = jax.random.PRNGKey(0)
    kx, kw, kb = jax.random.split(key, 3)

    # Input: (batch, seq, hidden) -> flatten rows for the kernel.
    x3 = jax.random.normal(kx, (batch, seq, hidden), dtype=jnp.float32)
    x = x3.reshape(batch * seq, hidden)

    # Deterministic synthetic Linear(hidden, hidden) parameters (the wrapped fn).
    w = jax.random.normal(kw, (hidden, hidden), dtype=jnp.float32) * 0.02
    b = jax.random.normal(kb, (1, hidden), dtype=jnp.float32) * 0.02

    out = jax.block_until_ready(residual_add_linear(x, w, b))

    # Pure-JAX reference: ResidualAdd(Linear) == x @ W + b + x
    ref = x @ w + b + x
    assert out.shape == (batch * seq, hidden)
    assert jnp.allclose(out, ref, atol=1e-4, rtol=1e-4), "mismatch vs reference"

    # Reshape back to (batch, seq, hidden) to mirror the module's output shape.
    out3 = out.reshape(batch, seq, hidden)
    assert out3.shape == x3.shape

    print("KERNEL_OK")
</pallas_src>

<mosaic_0001>
module attributes {stable_mosaic.version = 11 : i64} {
  func.func @kernel(%arg0: i32, %arg1: i32, %arg2: memref<16x128xf32, #tpu.memory_space<vmem>>, %arg3: memref<128x128xf32, #tpu.memory_space<vmem>>, %arg4: memref<1x128xf32, #tpu.memory_space<vmem>>, %arg5: memref<16x128xf32, #tpu.memory_space<vmem>>) attributes {dimension_semantics = [#tpu.dimension_semantics<parallel>, #tpu.dimension_semantics<parallel>], iteration_bounds = array<i64: 1, 1>, scalar_prefetch = 0 : i64, scratch_operands = 0 : i64, tpu.core_type = #tpu.core_type<tc>, window_params = [{transform_indices = @transform_0, window_bounds = array<i64: 16, 128>}, {transform_indices = @transform_1, window_bounds = array<i64: 128, 128>}, {transform_indices = @transform_2, window_bounds = array<i64: 1, 128>}, {transform_indices = @transform_3, window_bounds = array<i64: 16, 128>}]} {
    %c0 = arith.constant 0 : index
    %c0_0 = arith.constant 0 : index
    %0 = vector.load %arg2[%c0, %c0_0] : memref<16x128xf32, #tpu.memory_space<vmem>>, vector<16x128xf32>
    %c0_1 = arith.constant 0 : index
    %c0_2 = arith.constant 0 : index
    %1 = vector.load %arg3[%c0_1, %c0_2] : memref<128x128xf32, #tpu.memory_space<vmem>>, vector<128x128xf32>
    %cst = arith.constant dense<0.000000e+00> : vector<16x128xf32>
    %2 = tpu.matmul %0, %1, %cst {dimension_numbers = #tpu.dot_dimension_numbers<[1], [0], [0], [1], [0, 0, 1, 1], [], []>} : vector<16x128xf32>, vector<128x128xf32>, vector<16x128xf32> -> vector<16x128xf32>
    %c0_3 = arith.constant 0 : index
    %c0_4 = arith.constant 0 : index
    %3 = vector.load %arg4[%c0_3, %c0_4] : memref<1x128xf32, #tpu.memory_space<vmem>>, vector<1x128xf32>
    %4 = vector.broadcast %3 : vector<1x128xf32> to vector<16x128xf32>
    %5 = arith.addf %2, %4 : vector<16x128xf32>
    %6 = arith.addf %5, %0 : vector<16x128xf32>
    %c0_5 = arith.constant 0 : index
    %c0_6 = arith.constant 0 : index
    %7 = vector.load %arg5[%c0_5, %c0_6] : memref<16x128xf32, #tpu.memory_space<vmem>>, vector<16x128xf32>
    tpu.vector_store %arg5[%c0_5, %c0_6], %6 {strides = array<i32>} : memref<16x128xf32, #tpu.memory_space<vmem>>, vector<16x128xf32>,
    return
  }
  func.func @transform_0(%arg0: i32, %arg1: i32) -> (i32, i32) {
    %c0_i32 = arith.constant 0 : i32
    %c0_i32_0 = arith.constant 0 : i32
    return %arg1, %c0_i32 : i32, i32
  }
  func.func @transform_1(%arg0: i32, %arg1: i32) -> (i32, i32) {
    %c0_i32 = arith.constant 0 : i32
    %c0_i32_0 = arith.constant 0 : i32
    return %c0_i32, %arg0 : i32, i32
  }
  func.func @transform_2(%arg0: i32, %arg1: i32) -> (i32, i32) {
    %c0_i32 = arith.constant 0 : i32
    %c0_i32_0 = arith.constant 0 : i32
    return %c0_i32, %arg0 : i32, i32
  }
  func.func @transform_3(%arg0: i32, %arg1: i32) -> (i32, i32) {
    %c0_i32 = arith.constant 0 : i32
    return %arg1, %arg0 : i32, i32
  }
}

</mosaic_0001>

<bundles_post_ra>
// kernel: residual_add_linear.1
= control target key start
LH: loop header
LB: loop body
LE: loop exit
PB: predicated region body
PF: predicated region fallthrough
CT: control target
= control target key end

     0   :  { %s291_s1 = inlined_call_operand.vmem [shape: f32[128,128], index: 1, kind: input, shape index: {}]   ;;  %s292_s0 = inlined_call_operand.vmem [shape: f32[16,128], index: 0, kind: input, shape index: {}, may-alias: {0,3}]   ;;  %s293_s2 = inlined_call_operand.vmem [shape: f32[1,128], index: 2, kind: input, shape index: {}]   ;;  %s294_s3 = inlined_call_operand.vmem [shape: f32[16,128], index: 3, kind: output, shape index: {}, may-alias: {0,3}]  }
   0x1   :  { %v16_v0 = vld [vmem:[%s291_s1] sm:$0xff]  ;;  %v17_v1 = vld [vmem:[%s291_s1 + $0x8] sm:$0xff]  ;;  %v18_v2 = vld [vmem:[%s291_s1 + $0x10] sm:$0xff] }
   0x2   :  { %v176_v3 = vpack.c.bf16 %v17_v1, %v16_v0  ;;  %v19_v4 = vld [vmem:[%s291_s1 + $0x18] sm:$0xff]  ;;  %v20_v6 = vld [vmem:[%s291_s1 + $0x20] sm:$0xff]  ;;  %v21_v7 = vld [vmem:[%s291_s1 + $0x28] sm:$0xff] }
   0x3   :  { %v180_v5 = vpack.c.bf16 %v19_v4, %v18_v2  ;;  %v184_v8 = vpack.c.bf16 %v21_v7, %v20_v6  ;;  %v14_v9 = vld [vmem:[%s292_s0] sm:$0xff]  ;;  %v22_v10 = vld [vmem:[%s291_s1 + $0x30] sm:$0xff]  ;;  %v23_v11 = vld [vmem:[%s291_s1 + $0x38] sm:$0xff] }
   0x4   :  { %177 = vmatprep.subr.bf16.mxu0 %v176_v3  ;;  %173 = vmatprep.mubr.f32.mxu0 %v14_v9  ;;  %v188_v12 = vpack.c.bf16 %v23_v11, %v22_v10  ;;  %v24_v13 = vld [vmem:[%s291_s1 + $0x40] sm:$0xff]  ;;  %v25_v14 = vld [vmem:[%s291_s1 + $0x48] sm:$0xff]  ;;  %v26_v16 = vld [vmem:[%s291_s1 + $0x50] sm:$0xff] }
   0x5   :  { %179 = vmatpush3.bf16.msra.mxu0 %v176_v3  ;;  %v192_v15 = vpack.c.bf16 %v25_v14, %v24_v13  ;;  %v27_v17 = vld [vmem:[%s291_s1 + $0x58] sm:$0xff]  ;;  %v28_v19 = vld [vmem:[%s291_s1 + $0x60] sm:$0xff]  ;;  %v29_v20 = vld [vmem:[%s291_s1 + $0x68] sm:$0xff] }
   0x6   :  { %181 = vmatprep.subr.bf16.mxu0 %v180_v5  ;;  %v196_v18 = vpack.c.bf16 %v27_v17, %v26_v16  ;;  %v200_v21 = vpack.c.bf16 %v29_v20, %v28_v19  ;;  %v30_v22 = vld [vmem:[%s291_s1 + $0x70] sm:$0xff]  ;;  %v31_v23 = vld [vmem:[%s291_s1 + $0x78] sm:$0xff]  ;;  %v15_v25 = vld [vmem:[%s292_s0 + $0x8] sm:$0xff] }
   0x7   :  { %v204_v24 = vpack.c.bf16 %v31_v23, %v30_v22  ;;  %v122_v26 = vld [vmem:[%s293_s2] ss:$0 sm:$0xff] }
   0x9   :  { %183 = vmatpush3.bf16.msra.mxu0 %v180_v5 }
   0xa   :  { %185 = vmatprep.subr.bf16.mxu0 %v184_v8 }
   0xd   :  { %187 = vmatpush3.bf16.msra.mxu0 %v184_v8 }
   0xe   :  { %189 = vmatprep.subr.bf16.mxu0 %v188_v12 }
  0x11   :  { %191 = vmatpush3.bf16.msra.mxu0 %v188_v12 }
  0x12   :  { %193 = vmatprep.subr.bf16.mxu0 %v192_v15 }
  0x15   :  { %195 = vmatpush3.bf16.msra.mxu0 %v192_v15 }
  0x16   :  { %197 = vmatprep.subr.bf16.mxu0 %v196_v18 }
  0x19   :  { %199 = vmatpush3.bf16.msra.mxu0 %v196_v18 }
  0x1a   :  { %201 = vmatprep.subr.bf16.mxu0 %v200_v21 }
  0x1d   :  { %203 = vmatpush3.bf16.msra.mxu0 %v200_v21 }
  0x1e   :  { %205 = vmatprep.subr.bf16.mxu0 %v204_v24 }
  0x21   :  { %207 = vmatpush3.bf16.msra.mxu0 %v204_v24 }
  0x24   :  { %174 = vmatmul.mubr.f32.vlgmr.msra.gmra.mrb[0].mxu0 %v15_v25 }
  0xf7   :  { %v175_v27 = vpop.f32.mrb[0].mxu0 }
  0xf8   :  { %v111_v28 = vadd.f32 %v175_v27, %v122_v26  ;;  %v105_v29 = vpop.f32.mrb[1].mxu0 }
  0xf9   :  { %v106_v30 = vadd.f32 %v122_v26, %v105_v29 }
  0xfa   :  { %v115_v31 = vadd.f32 %v111_v28, %v15_v25 }
  0xfb   :  { %v114_v32 = vadd.f32 %v106_v30, %v14_v9 }
  0xfc   :  { %117 = vst [vmem:[%s294_s3 + $0x8] sm:$0xff] %v115_v31 }
  0xfd   :  { %116 = vst [vmem:[%s294_s3] sm:$0xff] %v114_v32 }

</bundles_post_ra>
